<compile_context>
chip_gen: v7x
topology: tpu7x:2x2x1
jax: 0.10.0
libtpu: 0.0.40
codegen_flags: <defaults>
</compile_context>

<pallas_src>
import functools
import math

import jax
import jax.numpy as jnp
from jax.experimental import pallas as pl
from jax.experimental.pallas import tpu as pltpu


def _partials_kernel(pred_ref, tgt_ref, sse_ref, sum_ref, sumsq_ref):
    """Accumulate per-feature partials for one (TILE_B, TILE_D) slab.

    Grid = (feature_tiles, batch_tiles); the batch axis (last) is the reduction axis,
    so the (1, TILE_D) output blocks stay resident in VMEM and act as accumulators.
    """
    i = pl.program_id(1)  # batch-tile index (reduction axis)

    @pl.when(i == 0)
    def _init():
        sse_ref[...] = jnp.zeros_like(sse_ref)
        sum_ref[...] = jnp.zeros_like(sum_ref)
        sumsq_ref[...] = jnp.zeros_like(sumsq_ref)

    p = pred_ref[...].astype(jnp.float32)
    t = tgt_ref[...].astype(jnp.float32)
    d = p - t

    # Per-feature (lane-wise) partials; only a sublane reduce per step (XLU slot is
    # free filler on this DMA-bound roofline).  Full scalar collapse happens in JAX.
    sse_ref[...] += jnp.sum(d * d, axis=0, keepdims=True)
    sum_ref[...] += jnp.sum(p, axis=0, keepdims=True)
    sumsq_ref[...] += jnp.sum(p * p, axis=0, keepdims=True)


def _pick_tile(extent, unit, max_tile):
    """Largest multiple of `unit` that divides `extent`, capped at `max_tile`.

    Falls back to the full extent (always a legal block shape) when no such
    divisor exists (e.g. extent < unit, or extent not a multiple of unit).
    """
    cap = min(extent, max_tile)
    t = (cap // unit) * unit
    while t >= unit:
        if extent % t == 0:
            return t
        t -= unit
    return extent


@jax.jit
def _base_loss_fn(pred, tgt, eff_w):
    """MSE(pred, tgt) + eff_w * (- mean over features of batch-variance(pred))."""
    B, D = pred.shape

    # Minimum sublane count depends on dtype packing (f32: 8, bf16: 16, int8: 32).
    if pred.dtype == jnp.bfloat16:
        sub_min = 16
    elif pred.dtype in (jnp.int8, jnp.uint8):
        sub_min = 32
    else:
        sub_min = 8

    tile_d = _pick_tile(D, 128, 1024)   # wide lane tiles; multiple of 128 when possible
    tile_b = _pick_tile(B, sub_min, 256)
    grid = (D // tile_d, B // tile_b)

    sse, psum, psumsq = pl.pallas_call(
        _partials_kernel,
        out_shape=(
            jax.ShapeDtypeStruct((1, D), jnp.float32),
            jax.ShapeDtypeStruct((1, D), jnp.float32),
            jax.ShapeDtypeStruct((1, D), jnp.float32),
        ),
        grid_spec=pltpu.PrefetchScalarGridSpec(
            num_scalar_prefetch=0,
            grid=grid,
            in_specs=[
                pl.BlockSpec((tile_b, tile_d), lambda j, i: (i, j)),  # predictions
                pl.BlockSpec((tile_b, tile_d), lambda j, i: (i, j)),  # targets
            ],
            out_specs=(
                pl.BlockSpec((1, tile_d), lambda j, i: (0, j)),  # per-feature SSE
                pl.BlockSpec((1, tile_d), lambda j, i: (0, j)),  # per-feature sum(p)
                pl.BlockSpec((1, tile_d), lambda j, i: (0, j)),  # per-feature sum(p*p)
            ),
        ),
        compiler_params=pltpu.CompilerParams(
            # feature axis independent (megacore-shardable), batch axis is the reduction
            dimension_semantics=("parallel", "arbitrary"),
        ),
    )(pred, tgt)

    n = jnp.float32(B)
    mse = jnp.sum(sse) / jnp.float32(B * D)
    mean = psum / n
    var = psumsq / n - mean * mean          # one-pass batch variance per feature
    diversity_loss = -(jnp.sum(var) / jnp.float32(D))
    return mse + eff_w.astype(jnp.float32) * diversity_loss


class DiversityRegularizedMSELoss:
    """Synthetic concrete base loss exposing a `diversity_loss_weight` attribute."""

    def __init__(self, diversity_loss_weight: float = 0.1):
        self.diversity_loss_weight = diversity_loss_weight

    def __call__(self, model_outputs, batch):
        pred = model_outputs["predictions"]
        tgt = batch["targets"]
        # Pass the (possibly scheduler-scaled) weight as a traced device scalar so the
        # jitted pallas path is not re-traced / re-baked when the schedule changes.
        eff_w = jnp.asarray(self.diversity_loss_weight, dtype=jnp.float32)
        return _base_loss_fn(pred, tgt, eff_w)


class AdaptiveLoss:
    """JAX/Pallas port of the PyTorch AdaptiveLoss wrapper (forward semantics)."""

    def __init__(self, base_loss, diversity_scheduler: str = "cosine", warmup_steps: int = 1000):
        self.base_loss = base_loss
        self.diversity_scheduler = diversity_scheduler
        self.warmup_steps = warmup_steps
        self.step_count = 0

    def __call__(self, model_outputs, batch, step=None):
        if step is not None:
            self.step_count = step
        else:
            self.step_count += 1

        if self.diversity_scheduler == "cosine":
            progress = min(self.step_count / self.warmup_steps, 1.0)
            diversity_weight = 0.5 * (1.0 + math.cos(progress * 3.14159))
        elif self.diversity_scheduler == "linear":
            progress = min(self.step_count / self.warmup_steps, 1.0)
            diversity_weight = 1.0 - progress
        else:
            diversity_weight = 1.0

        # Same protocol as the PyTorch module: temporarily scale the attribute.
        # The scaled value is fed to the jitted loss as a runtime array, so this
        # host-side mutation is jit-safe.
        if hasattr(self.base_loss, "diversity_loss_weight"):
            original_weight = self.base_loss.diversity_loss_weight
            self.base_loss.diversity_loss_weight = original_weight * diversity_weight
            loss = self.base_loss(model_outputs, batch)
            self.base_loss.diversity_loss_weight = original_weight
        else:
            loss = self.base_loss(model_outputs, batch)
        return loss


if __name__ == "__main__":
    # Small deterministic example: B=8 "samples", D=256 features (f32).
    B, D = 8, 256
    key = jax.random.PRNGKey(0)
    k_pred, k_tgt = jax.random.split(key)
    pred = jax.random.normal(k_pred, (B, D), dtype=jnp.float32)
    tgt = jax.random.normal(k_tgt, (B, D), dtype=jnp.float32)

    model_outputs = {"predictions": pred}
    batch = {"targets": tgt}

    base = DiversityRegularizedMSELoss(diversity_loss_weight=0.1)
    adaptive = AdaptiveLoss(base, diversity_scheduler="cosine", warmup_steps=1000)

    loss = adaptive(model_outputs, batch, step=100)
    loss = jax.block_until_ready(loss)

    # Pure-JAX reference check of the same forward semantics.
    progress = min(100 / 1000, 1.0)
    dw = 0.5 * (1.0 + math.cos(progress * 3.14159))
    eff_w = 0.1 * dw
    mse_ref = jnp.mean((pred - tgt) ** 2)
    var_ref = jnp.mean(jnp.var(pred, axis=0))
    loss_ref = mse_ref - eff_w * var_ref
    assert jnp.allclose(loss, loss_ref, rtol=1e-5, atol=1e-5), (loss, loss_ref)

    # Exercise the batch/feature tiling path with a larger shape as well.
    B2, D2 = 64, 1024
    k2a, k2b = jax.random.split(jax.random.PRNGKey(1))
    pred2 = jax.random.normal(k2a, (B2, D2), dtype=jnp.float32)
    tgt2 = jax.random.normal(k2b, (B2, D2), dtype=jnp.float32)
    loss2 = adaptive({"predictions": pred2}, {"targets": tgt2}, step=2000)
    loss2 = jax.block_until_ready(loss2)
    mse2 = jnp.mean((pred2 - tgt2) ** 2)          # step >= warmup -> diversity_weight ~ 0
    dw2 = 0.5 * (1.0 + math.cos(1.0 * 3.14159))
    loss2_ref = mse2 - (0.1 * dw2) * jnp.mean(jnp.var(pred2, axis=0))
    assert jnp.allclose(loss2, loss2_ref, rtol=1e-5, atol=1e-5), (loss2, loss2_ref)

    print("KERNEL_OK")
</pallas_src>

<mosaic_0001>
module attributes {stable_mosaic.version = 11 : i64} {
  func.func @_partials_kernel(%arg0: i32, %arg1: i32, %arg2: memref<8x256xf32, #tpu.memory_space<vmem>>, %arg3: memref<8x256xf32, #tpu.memory_space<vmem>>, %arg4: memref<1x256xf32, #tpu.memory_space<vmem>>, %arg5: memref<1x256xf32, #tpu.memory_space<vmem>>, %arg6: memref<1x256xf32, #tpu.memory_space<vmem>>) attributes {dimension_semantics = [#tpu.dimension_semantics<parallel>, #tpu.dimension_semantics<arbitrary>], iteration_bounds = array<i64: 1, 1>, scalar_prefetch = 0 : i64, scratch_operands = 0 : i64, tpu.core_type = #tpu.core_type<tc>, window_params = [{transform_indices = @transform_0, window_bounds = array<i64: 8, 256>}, {transform_indices = @transform_1, window_bounds = array<i64: 8, 256>}, {transform_indices = @transform_2, window_bounds = array<i64: 1, 256>}, {transform_indices = @transform_3, window_bounds = array<i64: 1, 256>}, {transform_indices = @transform_4, window_bounds = array<i64: 1, 256>}]} {
    %c0_i32 = arith.constant 0 : i32
    %0 = arith.cmpi eq, %arg1, %c0_i32 : i32
    %1 = arith.extui %0 : i1 to i32
    %c0_i32_0 = arith.constant 0 : i32
    %2 = arith.cmpi ne, %1, %c0_i32_0 : i32
    scf.if %2 {
      %cst_18 = arith.constant 0.000000e+00 : f32
      %23 = vector.broadcast %cst_18 : f32 to vector<1x256xf32>
      %c0_19 = arith.constant 0 : index
      %c0_20 = arith.constant 0 : index
      %24 = vector.load %arg4[%c0_19, %c0_20] : memref<1x256xf32, #tpu.memory_space<vmem>>, vector<1x256xf32>
      tpu.vector_store %arg4[%c0_19, %c0_20], %23 {strides = array<i32>} : memref<1x256xf32, #tpu.memory_space<vmem>>, vector<1x256xf32>,
      %cst_21 = arith.constant 0.000000e+00 : f32
      %25 = vector.broadcast %cst_21 : f32 to vector<1x256xf32>
      %c0_22 = arith.constant 0 : index
      %c0_23 = arith.constant 0 : index
      %26 = vector.load %arg5[%c0_22, %c0_23] : memref<1x256xf32, #tpu.memory_space<vmem>>, vector<1x256xf32>
      tpu.vector_store %arg5[%c0_22, %c0_23], %25 {strides = array<i32>} : memref<1x256xf32, #tpu.memory_space<vmem>>, vector<1x256xf32>,
      %cst_24 = arith.constant 0.000000e+00 : f32
      %27 = vector.broadcast %cst_24 : f32 to vector<1x256xf32>
      %c0_25 = arith.constant 0 : index
      %c0_26 = arith.constant 0 : index
      %28 = vector.load %arg6[%c0_25, %c0_26] : memref<1x256xf32, #tpu.memory_space<vmem>>, vector<1x256xf32>
      tpu.vector_store %arg6[%c0_25, %c0_26], %27 {strides = array<i32>} : memref<1x256xf32, #tpu.memory_space<vmem>>, vector<1x256xf32>,
    } else {
    }
    %c0 = arith.constant 0 : index
    %c0_1 = arith.constant 0 : index
    %3 = vector.load %arg2[%c0, %c0_1] : memref<8x256xf32, #tpu.memory_space<vmem>>, vector<8x256xf32>
    %c0_2 = arith.constant 0 : index
    %c0_3 = arith.constant 0 : index
    %4 = vector.load %arg3[%c0_2, %c0_3] : memref<8x256xf32, #tpu.memory_space<vmem>>, vector<8x256xf32>
    %5 = arith.subf %3, %4 : vector<8x256xf32>
    %c0_4 = arith.constant 0 : index
    %c0_5 = arith.constant 0 : index
    %6 = vector.load %arg4[%c0_4, %c0_5] : memref<1x256xf32, #tpu.memory_space<vmem>>, vector<1x256xf32>
    %7 = arith.mulf %5, %5 : vector<8x256xf32>
    %cst = arith.constant dense<0.000000e+00> : vector<256xf32>
    %8 = vector.multi_reduction <add>, %7, %cst [0] : vector<8x256xf32> to vector<256xf32>
    %9 = vector.shape_cast %8 : vector<256xf32> to vector<1x256xf32>
    %10 = arith.addf %6, %9 : vector<1x256xf32>
    %c0_6 = arith.constant 0 : index
    %c0_7 = arith.constant 0 : index
    %11 = vector.load %arg4[%c0_6, %c0_7] : memref<1x256xf32, #tpu.memory_space<vmem>>, vector<1x256xf32>
    tpu.vector_store %arg4[%c0_6, %c0_7], %10 {strides = array<i32>} : memref<1x256xf32, #tpu.memory_space<vmem>>, vector<1x256xf32>,
    %c0_8 = arith.constant 0 : index
    %c0_9 = arith.constant 0 : index
    %12 = vector.load %arg5[%c0_8, %c0_9] : memref<1x256xf32, #tpu.memory_space<vmem>>, vector<1x256xf32>
    %cst_10 = arith.constant dense<0.000000e+00> : vector<256xf32>
    %13 = vector.multi_reduction <add>, %3, %cst_10 [0] : vector<8x256xf32> to vector<256xf32>
    %14 = vector.shape_cast %13 : vector<256xf32> to vector<1x256xf32>
    %15 = arith.addf %12, %14 : vector<1x256xf32>
    %c0_11 = arith.constant 0 : index
    %c0_12 = arith.constant 0 : index
    %16 = vector.load %arg5[%c0_11, %c0_12] : memref<1x256xf32, #tpu.memory_space<vmem>>, vector<1x256xf32>
    tpu.vector_store %arg5[%c0_11, %c0_12], %15 {strides = array<i32>} : memref<1x256xf32, #tpu.memory_space<vmem>>, vector<1x256xf32>,
    %c0_13 = arith.constant 0 : index
    %c0_14 = arith.constant 0 : index
    %17 = vector.load %arg6[%c0_13, %c0_14] : memref<1x256xf32, #tpu.memory_space<vmem>>, vector<1x256xf32>
    %18 = arith.mulf %3, %3 : vector<8x256xf32>
    %cst_15 = arith.constant dense<0.000000e+00> : vector<256xf32>
    %19 = vector.multi_reduction <add>, %18, %cst_15 [0] : vector<8x256xf32> to vector<256xf32>
    %20 = vector.shape_cast %19 : vector<256xf32> to vector<1x256xf32>
    %21 = arith.addf %17, %20 : vector<1x256xf32>
    %c0_16 = arith.constant 0 : index
    %c0_17 = arith.constant 0 : index
    %22 = vector.load %arg6[%c0_16, %c0_17] : memref<1x256xf32, #tpu.memory_space<vmem>>, vector<1x256xf32>
    tpu.vector_store %arg6[%c0_16, %c0_17], %21 {strides = array<i32>} : memref<1x256xf32, #tpu.memory_space<vmem>>, vector<1x256xf32>,
    return
  }
  func.func @transform_0(%arg0: i32, %arg1: i32) -> (i32, i32) {
    %c0_i32 = arith.constant 0 : i32
    return %arg1, %arg0 : i32, i32
  }
  func.func @transform_1(%arg0: i32, %arg1: i32) -> (i32, i32) {
    %c0_i32 = arith.constant 0 : i32
    return %arg1, %arg0 : i32, i32
  }
  func.func @transform_2(%arg0: i32, %arg1: i32) -> (i32, i32) {
    %c0_i32 = arith.constant 0 : i32
    %c0_i32_0 = arith.constant 0 : i32
    return %c0_i32, %arg0 : i32, i32
  }
  func.func @transform_3(%arg0: i32, %arg1: i32) -> (i32, i32) {
    %c0_i32 = arith.constant 0 : i32
    %c0_i32_0 = arith.constant 0 : i32
    return %c0_i32, %arg0 : i32, i32
  }
  func.func @transform_4(%arg0: i32, %arg1: i32) -> (i32, i32) {
    %c0_i32 = arith.constant 0 : i32
    %c0_i32_0 = arith.constant 0 : i32
    return %c0_i32, %arg0 : i32, i32
  }
}

</mosaic_0001>

<bundles_post_ra>
// kernel: _base_loss_fn.1
= control target key start
LH: loop header
LB: loop body
LE: loop exit
PB: predicated region body
PF: predicated region fallthrough
CT: control target
= control target key end

     0   :  { %10 = vsyncpa [#allocation3], 0  ;;  %s324_s0 = inlined_call_operand.hbm [shape: f32[8,256], index: 0, kind: input, shape index: {}]   ;;  %s325_s1 = inlined_call_operand.hbm [shape: f32[8,256], index: 1, kind: input, shape index: {}]   ;;  %s326_s2 = inlined_call_operand.vmem [shape: f32[1,256], index: 2, kind: output, shape index: {0}]   ;;  %s327_s3 = inlined_call_operand.vmem [shape: f32[1,256], index: 3, kind: output, shape index: {1}]   ;;  %s328_s4 = inlined_call_operand.vmem [shape: f32[1,256], index: 4, kind: output, shape index: {2}]  }
   0x1   :  { %11 = vsyncpa [#allocation5], 0  ;;  %s228_s15 = smov [#allocation2]   ;;  %s229_s17 = smov [#allocation4]  }
   0x2   :  { %s18_s16 = sshll.u32 %s228_s15, 4  ;;  %s28_s18 = sshll.u32 %s229_s17, 4  ;;  %s19_s16 = int_to_ptr.vmem [resolvable:$true] %s18_s16  ;;  %s29_s18 = int_to_ptr.vmem [resolvable:$true] %s28_s18 }
   0x3   :  { %s180_s21 = scalar_lea.hbm %s324_s0, 256 }
   0x4   :  { %p181_p0 = scmp.ne.s32.totalorder %s324_s0, %s180_s21  ;;  %p184_p1 = scmp.lt.u32.totalorder %s180_s21, %s324_s0 }
   0x6   :  { %p186_p2 = pnand %p184_p1, %p181_p0 }
   0x8   :  { %189 = shalt.err (!%p186_p2)
}
   0x9   :  { %s190_s26 = scalar_lea.vmem %s19_s16, 256  ;;  %p195_p4 = scmp.lt.s32.totalorder %s19_s16, %s19_s16 }
   0xa   :  { %p191_p3 = scmp.ne.s32.totalorder %s19_s16, %s190_s26  ;;  %p196_p5 = scmp.lt.s32.totalorder %s190_s26, %s190_s26 }
   0xc   :  { %p197_p6 = por %p196_p5, %p195_p4 }
   0xe   :  { %p198_p7 = pnand %p197_p6, %p191_p3 }
  0x10   :  { %201 = shalt.err (!%p198_p7)
}
  0x11   :  { %21 = dma.hbm_to_vmem [thread:$0]  %s324_s0, 256, %s19_s16, [#allocation3]  }
  0x12   :  { %s202_s5 = scalar_lea.hbm %s325_s1, 256 }
  0x13   :  { %p203_p8 = scmp.ne.s32.totalorder %s325_s1, %s202_s5  ;;  %p206_p9 = scmp.lt.u32.totalorder %s202_s5, %s325_s1 }
  0x15   :  { %p208_p10 = pnand %p206_p9, %p203_p8 }
  0x17   :  { %211 = shalt.err (!%p208_p10)
}
  0x18   :  { %s212_s10 = scalar_lea.vmem %s29_s18, 256  ;;  %p217_p12 = scmp.lt.s32.totalorder %s29_s18, %s29_s18 }
  0x19   :  { %p213_p11 = scmp.ne.s32.totalorder %s29_s18, %s212_s10  ;;  %p218_p13 = scmp.lt.s32.totalorder %s212_s10, %s212_s10 }
  0x1b   :  { %p219_p0 = por %p218_p13, %p217_p12 }
  0x1d   :  { %p220_p1 = pnand %p219_p0, %p213_p11 }
  0x1f   :  { %223 = shalt.err (!%p220_p1)
}
  0x20   :  { %31 = dma.hbm_to_vmem [thread:$0]  %s325_s1, 256, %s29_s18, [#allocation5]  }
  0x21   :  { %224 = dma.done.wait [#allocation3], 256  }
  0x22   :  { %225 = vsyncadd [#allocation3], 4294967040 }
  0x23   :  { %226 = dma.done.wait [#allocation5], 256  }
  0x24   :  { %227 = vsyncadd [#allocation5], 4294967040  ;;  %v42_v0 = vlaneseq  ;;  %v230_v2 = vmov 0.0   ;;  %v49_v3 = vld [vmem:[#allocation2] sm:$0xff]  ;;  %v50_v4 = vld [vmem:[#allocation2 + $0x8] sm:$0xff] }
  0x25   :  { %v51_v5 = vld [vmem:[#allocation4] sm:$0xff]  ;;  %v52_v6 = vld [vmem:[#allocation4 + $0x8] sm:$0xff]  ;;  %v95_v8 = vrot.slane %v49_v3, 4  ;;  %v101_v9 = vrot.slane %v50_v4, 4  ;;  %v128_v10 = vmul.f32 %v49_v3, %v49_v3  ;;  %v129_v12 = vmul.f32 %v50_v4, %v50_v4 }
  0x26   :  { %vm281_vm0 = vcmp.lt.s32.totalorder %v42_v0, 256  ;;  %v53_v7 = vsub.f32 %v49_v3, %v51_v5  ;;  %v54_v11 = vsub.f32 %v50_v4, %v52_v6  ;;  %v231_v13 = vmov 1966171168  }
  0x27   :  { %46 = vst.msk [vmem:[%s326_s2] sm:$0x3] %vm281_vm0, %v230_v2  ;;  %47 = vst.msk [vmem:[%s327_s3] sm:$0x3] %vm281_vm0, %v230_v2  ;;  %v74_v14 = vunpack.c.l.s4 %v231_v13  ;;  %v96_v16 = vadd.f32 %v95_v8, %v49_v3  ;;  %v102_v17 = vadd.f32 %v101_v9, %v50_v4  ;;  %v130_v19 = vrot.slane %v128_v10, 4 }
  0x28   :  { %48 = vst.msk [vmem:[%s328_s4] sm:$0x3] %vm281_vm0, %v230_v2  ;;  %v56_v15 = vmul.f32 %v53_v7, %v53_v7  ;;  %v57_v18 = vmul.f32 %v54_v11, %v54_v11  ;;  %v136_v20 = vrot.slane %v129_v12, 4  ;;  %v77_v24 = vshrl.u32 %v42_v0, 7 }
  0x29   :  { %v97_v22 = vrot.slane %v96_v16, 2  ;;  %v103_v23 = vrot.slane %v102_v17, 2  ;;  %v131_v26 = vadd.f32 %v130_v19, %v128_v10  ;;  %v75_v28 = vunpack.c.0.s8 %v74_v14 }
  0x2a   :  { %v58_v21 = vrot.slane %v56_v15, 4  ;;  %v64_v25 = vrot.slane %v57_v18, 4  ;;  %v137_v27 = vadd.f32 %v136_v20, %v129_v12 }
  0x2b   :  { %v98_v30 = vadd.f32 %v97_v22, %v96_v16  ;;  %v104_v31 = vadd.f32 %v103_v23, %v102_v17  ;;  %v132_v33 = vrot.slane %v131_v26, 2  ;;  %v78_v41 = vsub.s32 %v75_v28, %v77_v24 }
  0x2c   :  { %v59_v29 = vadd.f32 %v58_v21, %v56_v15  ;;  %v65_v32 = vadd.f32 %v64_v25, %v57_v18  ;;  %v138_v34 = vrot.slane %v137_v27, 2 }
  0x2d   :  { %v99_v36 = vrot.slane %v98_v30, 1  ;;  %v105_v37 = vrot.slane %v104_v31, 1  ;;  %v133_v39 = vadd.f32 %v132_v33, %v131_v26 }
  0x2e   :  { %v60_v35 = vrot.slane %v59_v29, 2  ;;  %v66_v38 = vrot.slane %v65_v32, 2  ;;  %v139_v40 = vadd.f32 %v138_v34, %v137_v27  ;;  %v94_v56 = vld [vmem:[%s327_s3] sm:$0x3] }
  0x2f   :  { %v100_v43 = vadd.f32 %v99_v36, %v98_v30  ;;  %v106_v44 = vadd.f32 %v105_v37, %v104_v31  ;;  %v134_v46 = vrot.slane %v133_v39, 1  ;;  %v127_v62 = vld [vmem:[%s328_s4] sm:$0x3] }
  0x30   :  { %v61_v42 = vadd.f32 %v60_v35, %v59_v29  ;;  %v67_v45 = vadd.f32 %v66_v38, %v65_v32  ;;  %v140_v47 = vrot.slane %v139_v40, 1  ;;  %v55_v2 = vld [vmem:[%s326_s2] sm:$0x3] }
  0x31   :  { %v109_v49 = vcombine.low %v100_v43, %v106_v44  ;;  %v135_v51 = vadd.f32 %v134_v46, %v133_v39 }
  0x32   :  { %v62_v48 = vrot.slane %v61_v42, 1  ;;  %v68_v50 = vrot.slane %v67_v45, 1  ;;  %v141_v52 = vadd.f32 %v140_v47, %v139_v40 }
  0x33   :  { %v116_v54 = vrot.slane %v109_v49, %v78_v41 }
  0x34   :  { %v63_v53 = vadd.f32 %v62_v48, %v61_v42  ;;  %v69_v55 = vadd.f32 %v68_v50, %v67_v45  ;;  %v144_v57 = vcombine.low %v135_v51, %v141_v52 }
  0x35   :  { %v123_v58 = vrot.slane %v116_v54, %v78_v41 }
  0x36   :  { %v72_v59 = vcombine.low %v63_v53, %v69_v55  ;;  %v151_v60 = vrot.slane %v144_v57, %v78_v41 }
  0x37   :  { %v125_v61 = vadd.f32 %v123_v58, %v94_v56 }
  0x38   :  { %v79_v63 = vrot.slane %v72_v59, %v78_v41  ;;  %v158_v0 = vrot.slane %v151_v60, %v78_v41 }
  0x39   :  { %126 = vst.msk [vmem:[%s327_s3] sm:$0x3] %vm281_vm0, %v125_v61 }
  0x3a   :  { %v86_v3 = vrot.slane %v79_v63, %v78_v41  ;;  %v160_v4 = vadd.f32 %v158_v0, %v127_v62 }
  0x3c   :  { %v88_v5 = vadd.f32 %v86_v3, %v55_v2  ;;  %161 = vst.msk [vmem:[%s328_s4] sm:$0x3] %vm281_vm0, %v160_v4 }
  0x3e   :  { %93 = vst.msk [vmem:[%s326_s2] sm:$0x3] %vm281_vm0, %v88_v5 }
  0x3f   :  { %174 = vsyncpa [#allocation3], 1 }
  0x40   :  { %175 = vsyncpa [#allocation5], 1 }

</bundles_post_ra>
